<compile_context>
chip_gen: v5e
topology: v5e:2x2
jax: 0.10.0
libtpu: 0.0.40
codegen_flags: <defaults>
</compile_context>

<pallas_src>
import jax
import jax.numpy as jnp
import numpy as np
from jax.experimental import pallas as pl
from jax.experimental.pallas import tpu as pltpu


def _round_up(n, m):
    return (n + m - 1) // m * m


# ---------------------------------------------------------------------------
# Fused kernel: backbone stand-in (1x1 conv + ReLU + GAP) + classifier head
# ---------------------------------------------------------------------------
def _fused_kernel(x_ref, wct_ref, bc_ref, w1_ref, shift_ref, w2_ref, b2_ref,
                  o_ref, feat_ref):
    # x_ref     : (TB, Cin, HW) f32   activations (lane axis = HW, dense)
    # wct_ref   : (Cin, FP)     bf16  conv weight (transposed 1x1 conv weight), F padded
    # bc_ref    : (1, FP)       f32   conv bias (padded)
    # w1_ref    : (FP, HID)     bf16  Linear(F,1024,no bias) with BN scale folded in
    # shift_ref : (1, HID)      f32   eval-mode BatchNorm shift
    # w2_ref    : (HID, CP)     bf16  final Linear weight, classes padded to CP
    # b2_ref    : (1, CP)       f32   final Linear bias (padded)
    # o_ref     : (TB, CP)      f32   logits for this batch tile
    # feat_ref  : (TB, FP)      f32   VMEM scratch for pooled backbone features
    tb, _, hw = x_ref.shape

    wct = wct_ref[...]                                       # (Cin, FP) bf16
    bc = bc_ref[...]                                         # (1, FP)  f32
    # Pooling row (hoisted out of the loop); 1/HW = 2^-8 is exact in bf16.
    pool = jnp.full((1, hw), 1.0 / hw, dtype=jnp.bfloat16)

    # --- backbone stand-in, per image (conv matmul already has M = HW = 256) ---
    # TODO(synk): if pl.lower_as_mlir shows an explicit vxpose for the
    # transposed-LHS dot below, pad Cin to 8 in the wrapper.
    def conv_pool(b, carry):
        xb = x_ref[b].astype(jnp.bfloat16)                   # (Cin, HW) bf16 (in-kernel cast)
        # 1x1 conv as transposed matmul: x^T (HW,Cin) . wct (Cin,FP) -> (HW,FP)
        h = jax.lax.dot_general(
            xb, wct,
            dimension_numbers=(((0,), (0,)), ((), ())),
            preferred_element_type=jnp.float32)              # (HW, FP) f32
        h = jnp.maximum(h + bc, 0.0)                         # bias + ReLU (f32)
        # Global average pool on the MXU: (1,HW) @ (HW,FP) -> (1,FP)
        f = jnp.dot(pool, h.astype(jnp.bfloat16),
                    preferred_element_type=jnp.float32)      # (1, FP) f32
        feat_ref[pl.ds(b, 1), :] = f
        return carry

    jax.lax.fori_loop(0, tb, conv_pool, 0)

    # --- classifier head, batched over the whole tile (M = TB) ---
    feat = feat_ref[...].astype(jnp.bfloat16)                # (TB, FP)
    # Linear(F,1024,no bias) with BN scale pre-folded, then BN shift + ReLU.
    z = jnp.dot(feat, w1_ref[...],
                preferred_element_type=jnp.float32)          # (TB, HID) f32
    z = jnp.maximum(z + shift_ref[...], 0.0)

    # TODO(synk): Dropout(0.4) is identity in eval mode; training-mode dropout
    # (pltpu.prng_seed + stateful_bernoulli) intentionally not applied here.

    # final_layer: Linear(1024, num_classes) (classes padded to CP)
    out = jnp.dot(z.astype(jnp.bfloat16), w2_ref[...],
                  preferred_element_type=jnp.float32) + b2_ref[...]
    o_ref[...] = out                                         # (TB, CP) f32, dense store


# ---------------------------------------------------------------------------
# One-time weight prep (call once, reuse across forwards)
# ---------------------------------------------------------------------------
def prepare_params(params):
    """BN fold into w1, bf16 casts, lane padding (F->128k, classes->128k).

    Hoisted out of the per-call path so weights are not re-read / re-padded
    on every forward (matters once F is a real backbone width of 512-2048).
    """
    Cin, F = params["conv_w_t"].shape
    HID = params["w1"].shape[1]
    C = params["w2"].shape[1]
    FP = _round_up(F, 128)
    CP = _round_up(C, 128)

    eps = 1e-5
    scale = params["bn_gamma"] * jax.lax.rsqrt(params["bn_var"] + eps)   # (HID,)
    shift = (params["bn_beta"] - params["bn_mean"] * scale).reshape(1, HID)

    wct = jnp.zeros((Cin, FP), jnp.bfloat16).at[:, :F].set(
        params["conv_w_t"].astype(jnp.bfloat16))
    bc = jnp.zeros((1, FP), jnp.float32).at[:, :F].set(
        params["conv_b"].astype(jnp.float32))
    # Fold the BN scale into w1's columns (output features of the Linear).
    w1s = jnp.zeros((FP, HID), jnp.bfloat16).at[:F, :].set(
        (params["w1"] * scale[None, :]).astype(jnp.bfloat16))
    w2p = jnp.zeros((HID, CP), jnp.bfloat16).at[:, :C].set(
        params["w2"].astype(jnp.bfloat16))
    b2p = jnp.zeros((1, CP), jnp.float32).at[:, :C].set(
        params["b2"].astype(jnp.float32))

    return {"wct": wct, "bc": bc, "w1s": w1s,
            "shift": shift.astype(jnp.float32), "w2": w2p, "b2": b2p}


# ---------------------------------------------------------------------------
# Wrapper: batch tiling + one pallas_call
# ---------------------------------------------------------------------------
def full_model_forward(x_nchw, prepped, *, num_classes, block_b=128):
    B, Cin, H, W = x_nchw.shape
    HW = H * W
    FP = prepped["wct"].shape[1]
    HID = prepped["w1s"].shape[1]
    CP = prepped["w2"].shape[1]

    # Batch tile: head matmuls get M = TB rows; batch remainder is zero-padded
    # and sliced off below.
    # Tuning note: on v5e/v6e (1 TC) prefer one grid step with TB up to 128/256;
    # on v7x (2 TCs) keep the grid length >= 2 so both cores get a block.
    TB = min(_round_up(B, 8), block_b)
    B_pad = _round_up(B, TB)

    # Free reshape of NCHW (no transpose): lane axis = HW (dense); stays f32
    # (bf16 cast happens in-kernel -> half the activation HBM traffic).
    x = x_nchw.reshape(B, Cin, HW)
    if B_pad != B:
        x = jnp.zeros((B_pad, Cin, HW), x.dtype).at[:B].set(x)

    out_padded = pl.pallas_call(
        _fused_kernel,
        out_shape=jax.ShapeDtypeStruct((B_pad, CP), jnp.float32),
        grid_spec=pltpu.PrefetchScalarGridSpec(
            num_scalar_prefetch=0,
            grid=(B_pad // TB,),                              # parallel batch axis
            in_specs=[
                pl.BlockSpec((TB, Cin, HW), lambda g: (g, 0, 0)),
                # grid-invariant weights: constant index_map -> fetched once
                pl.BlockSpec((Cin, FP), lambda g: (0, 0)),
                pl.BlockSpec((1, FP), lambda g: (0, 0)),
                pl.BlockSpec((FP, HID), lambda g: (0, 0)),
                pl.BlockSpec((1, HID), lambda g: (0, 0)),
                pl.BlockSpec((HID, CP), lambda g: (0, 0)),
                pl.BlockSpec((1, CP), lambda g: (0, 0)),
            ],
            out_specs=pl.BlockSpec((TB, CP), lambda g: (g, 0)),
            scratch_shapes=[pltpu.VMEM((TB, FP), jnp.float32)],
        ),
        compiler_params=pltpu.CompilerParams(
            dimension_semantics=("parallel",),                # megacore on v7x
            vmem_limit_bytes=32 * 1024 * 1024,
        ),
    )(x, prepped["wct"], prepped["bc"], prepped["w1s"], prepped["shift"],
      prepped["w2"], prepped["b2"])

    return out_padded[:B, :num_classes]


# ---------------------------------------------------------------------------
# Pure-JAX reference with identical math / cast points (correctness check)
# ---------------------------------------------------------------------------
def full_model_ref(x_nchw, params):
    B, Cin, H, W = x_nchw.shape
    HID = params["w1"].shape[1]
    x = x_nchw.reshape(B, Cin, H * W).astype(jnp.bfloat16)
    wct = params["conv_w_t"].astype(jnp.bfloat16)
    h = jnp.einsum("bcp,cf->bpf", x, wct, preferred_element_type=jnp.float32)
    h = jnp.maximum(h + params["conv_b"][None, None, :], 0.0)
    # Match the kernel's bf16 pooling operand (f32 accumulation).
    feats = jnp.mean(h.astype(jnp.bfloat16).astype(jnp.float32), axis=1)  # (B, F)

    eps = 1e-5
    scale = params["bn_gamma"] * jax.lax.rsqrt(params["bn_var"] + eps)
    shift = params["bn_beta"] - params["bn_mean"] * scale
    w1s = (params["w1"] * scale[None, :]).astype(jnp.bfloat16)
    z = jnp.dot(feats.astype(jnp.bfloat16), w1s,
                preferred_element_type=jnp.float32)
    z = jnp.maximum(z + shift[None, :], 0.0)
    out = jnp.dot(z.astype(jnp.bfloat16), params["w2"].astype(jnp.bfloat16),
                  preferred_element_type=jnp.float32) + params["b2"]
    return out


if __name__ == "__main__":
    # Small shapes consistent with the module's forward (NCHW input like PyTorch).
    B, Cin, H, W = 2, 4, 16, 16
    F = 64        # stand-in backbone.fc.in_features (num_features)
    HID = 1024    # classifier hidden width (from the module)
    C = 16        # num_classes

    key = jax.random.PRNGKey(0)
    ks = jax.random.split(key, 9)
    params = {
        # TODO(synk): real pretrained backbone is an opaque ctor arg in PyTorch;
        # this deterministic 1x1-conv + ReLU + GAP stand-in defines F = 64.
        "conv_w_t": jax.random.normal(ks[0], (Cin, F), jnp.float32) * 0.1,
        "conv_b": jax.random.normal(ks[1], (F,), jnp.float32) * 0.1,
        "w1": jax.random.normal(ks[2], (F, HID), jnp.float32) * 0.05,
        "bn_gamma": 1.0 + 0.1 * jax.random.normal(ks[3], (HID,), jnp.float32),
        "bn_beta": 0.1 * jax.random.normal(ks[4], (HID,), jnp.float32),
        "bn_mean": 0.05 * jax.random.normal(ks[5], (HID,), jnp.float32),
        "bn_var": jnp.abs(1.0 + 0.1 * jax.random.normal(ks[6], (HID,),
                                                        jnp.float32)),
        "w2": jax.random.normal(ks[7], (HID, C), jnp.float32) * 0.03,
        "b2": jnp.linspace(-0.1, 0.1, C, dtype=jnp.float32),
    }
    x = jax.random.normal(ks[8], (B, Cin, H, W), jnp.float32)

    # One-time weight prep (cached; NOT re-done per forward call).
    prepped = jax.block_until_ready(prepare_params(params))

    fwd = jax.jit(lambda xx, pp: full_model_forward(xx, pp, num_classes=C))
    out = jax.block_until_ready(fwd(x, prepped))

    ref = jax.block_until_ready(full_model_ref(x, params))
    np.testing.assert_allclose(np.asarray(out), np.asarray(ref),
                               rtol=2e-3, atol=2e-3)
    assert out.shape == (B, C)
    print("KERNEL_OK")
</pallas_src>

<mosaic_0001>
module attributes {stable_mosaic.version = 11 : i64} {
  func.func @_fused_kernel(%arg0: i32, %arg1: memref<8x4x256xf32, #tpu.memory_space<vmem>>, %arg2: memref<4x128xbf16, #tpu.memory_space<vmem>>, %arg3: memref<1x128xf32, #tpu.memory_space<vmem>>, %arg4: memref<128x1024xbf16, #tpu.memory_space<vmem>>, %arg5: memref<1x1024xf32, #tpu.memory_space<vmem>>, %arg6: memref<1024x128xbf16, #tpu.memory_space<vmem>>, %arg7: memref<1x128xf32, #tpu.memory_space<vmem>>, %arg8: memref<8x128xf32, #tpu.memory_space<vmem>>, %arg9: memref<8x128xf32, #tpu.memory_space<vmem>>) attributes {dimension_semantics = [#tpu.dimension_semantics<parallel>], iteration_bounds = array<i64: 1>, scalar_prefetch = 0 : i64, scratch_operands = 1 : i64, tpu.core_type = #tpu.core_type<tc>, window_params = [{transform_indices = @transform_0, window_bounds = array<i64: 8, 4, 256>}, {pipeline_mode = #tpu.pipeline_mode<synchronous>, transform_indices = @transform_1, window_bounds = array<i64: 4, 128>}, {pipeline_mode = #tpu.pipeline_mode<synchronous>, transform_indices = @transform_2, window_bounds = array<i64: 1, 128>}, {pipeline_mode = #tpu.pipeline_mode<synchronous>, transform_indices = @transform_3, window_bounds = array<i64: 128, 1024>}, {pipeline_mode = #tpu.pipeline_mode<synchronous>, transform_indices = @transform_4, window_bounds = array<i64: 1, 1024>}, {pipeline_mode = #tpu.pipeline_mode<synchronous>, transform_indices = @transform_5, window_bounds = array<i64: 1024, 128>}, {pipeline_mode = #tpu.pipeline_mode<synchronous>, transform_indices = @transform_6, window_bounds = array<i64: 1, 128>}, {transform_indices = @transform_7, window_bounds = array<i64: 8, 128>}]} {
    %c0 = arith.constant 0 : index
    %c0_0 = arith.constant 0 : index
    %0 = vector.load %arg2[%c0, %c0_0] : memref<4x128xbf16, #tpu.memory_space<vmem>>, vector<4x128xbf16>
    %c0_1 = arith.constant 0 : index
    %c0_2 = arith.constant 0 : index
    %1 = vector.load %arg3[%c0_1, %c0_2] : memref<1x128xf32, #tpu.memory_space<vmem>>, vector<1x128xf32>
    %cst = arith.constant 3.906250e-03 : bf16
    %2 = vector.broadcast %cst : bf16 to vector<1x256xbf16>
    %c0_i32 = arith.constant 0 : i32
    %c8_i32 = arith.constant 8 : i32
    %3 = arith.addi %c0_i32, %c8_i32 : i32
    %c1_i32 = arith.constant 1 : i32
    scf.for %arg10 = %c0_i32 to %3 step %c1_i32  : i32 {
      %20 = arith.index_cast %arg10 : i32 to index
      %c0_19 = arith.constant 0 : index
      %c0_20 = arith.constant 0 : index
      %21 = vector.load %arg1[%20, %c0_19, %c0_20] : memref<8x4x256xf32, #tpu.memory_space<vmem>>, vector<1x4x256xf32>
      %22 = vector.shape_cast %21 : vector<1x4x256xf32> to vector<4x256xf32>
      %23 = arith.truncf %22 : vector<4x256xf32> to vector<4x256xbf16>
      %cst_21 = arith.constant dense<0.000000e+00> : vector<256x128xf32>
      %24 = tpu.matmul %23, %0, %cst_21 {dimension_numbers = #tpu.dot_dimension_numbers<[0], [0], [1], [1], [0, 1, 1, 1], [], []>} : vector<4x256xbf16>, vector<4x128xbf16>, vector<256x128xf32> -> vector<256x128xf32>
      %25 = vector.broadcast %1 : vector<1x128xf32> to vector<256x128xf32>
      %26 = arith.addf %24, %25 : vector<256x128xf32>
      %cst_22 = arith.constant 0.000000e+00 : f32
      %27 = vector.broadcast %cst_22 : f32 to vector<256x128xf32>
      %28 = arith.maximumf %26, %27 : vector<256x128xf32>
      %29 = arith.truncf %28 : vector<256x128xf32> to vector<256x128xbf16>
      %cst_23 = arith.constant dense<0.000000e+00> : vector<1x128xf32>
      %30 = tpu.matmul %2, %29, %cst_23 {dimension_numbers = #tpu.dot_dimension_numbers<[1], [0], [0], [1], [0, 0, 1, 1], [], []>} : vector<1x256xbf16>, vector<256x128xbf16>, vector<1x128xf32> -> vector<1x128xf32>
      %31 = arith.index_cast %arg10 : i32 to index
      %c0_24 = arith.constant 0 : index
      %32 = vector.load %arg9[%31, %c0_24] : memref<8x128xf32, #tpu.memory_space<vmem>>, vector<1x128xf32>
      tpu.vector_store %arg9[%31, %c0_24], %30 {strides = array<i32>} : memref<8x128xf32, #tpu.memory_space<vmem>>, vector<1x128xf32>,
    }
    %c8_i32_3 = arith.constant 8 : i32
    %c0_4 = arith.constant 0 : index
    %c0_5 = arith.constant 0 : index
    %4 = vector.load %arg9[%c0_4, %c0_5] : memref<8x128xf32, #tpu.memory_space<vmem>>, vector<8x128xf32>
    %5 = arith.truncf %4 : vector<8x128xf32> to vector<8x128xbf16>
    %c0_6 = arith.constant 0 : index
    %c0_7 = arith.constant 0 : index
    %6 = vector.load %arg4[%c0_6, %c0_7] : memref<128x1024xbf16, #tpu.memory_space<vmem>>, vector<128x1024xbf16>
    %cst_8 = arith.constant dense<0.000000e+00> : vector<8x1024xf32>
    %7 = tpu.matmul %5, %6, %cst_8 {dimension_numbers = #tpu.dot_dimension_numbers<[1], [0], [0], [1], [0, 0, 1, 1], [], []>} : vector<8x128xbf16>, vector<128x1024xbf16>, vector<8x1024xf32> -> vector<8x1024xf32>
    %c0_9 = arith.constant 0 : index
    %c0_10 = arith.constant 0 : index
    %8 = vector.load %arg5[%c0_9, %c0_10] : memref<1x1024xf32, #tpu.memory_space<vmem>>, vector<1x1024xf32>
    %9 = vector.broadcast %8 : vector<1x1024xf32> to vector<8x1024xf32>
    %10 = arith.addf %7, %9 : vector<8x1024xf32>
    %cst_11 = arith.constant 0.000000e+00 : f32
    %11 = vector.broadcast %cst_11 : f32 to vector<8x1024xf32>
    %12 = arith.maximumf %10, %11 : vector<8x1024xf32>
    %13 = arith.truncf %12 : vector<8x1024xf32> to vector<8x1024xbf16>
    %c0_12 = arith.constant 0 : index
    %c0_13 = arith.constant 0 : index
    %14 = vector.load %arg6[%c0_12, %c0_13] : memref<1024x128xbf16, #tpu.memory_space<vmem>>, vector<1024x128xbf16>
    %cst_14 = arith.constant dense<0.000000e+00> : vector<8x128xf32>
    %15 = tpu.matmul %13, %14, %cst_14 {dimension_numbers = #tpu.dot_dimension_numbers<[1], [0], [0], [1], [0, 0, 1, 1], [], []>} : vector<8x1024xbf16>, vector<1024x128xbf16>, vector<8x128xf32> -> vector<8x128xf32>
    %c0_15 = arith.constant 0 : index
    %c0_16 = arith.constant 0 : index
    %16 = vector.load %arg7[%c0_15, %c0_16] : memref<1x128xf32, #tpu.memory_space<vmem>>, vector<1x128xf32>
    %17 = vector.broadcast %16 : vector<1x128xf32> to vector<8x128xf32>
    %18 = arith.addf %15, %17 : vector<8x128xf32>
    %c0_17 = arith.constant 0 : index
    %c0_18 = arith.constant 0 : index
    %19 = vector.load %arg8[%c0_17, %c0_18] : memref<8x128xf32, #tpu.memory_space<vmem>>, vector<8x128xf32>
    tpu.vector_store %arg8[%c0_17, %c0_18], %18 {strides = array<i32>} : memref<8x128xf32, #tpu.memory_space<vmem>>, vector<8x128xf32>,
    return
  }
  func.func @transform_0(%arg0: i32) -> (i32, i32, i32) {
    %c0_i32 = arith.constant 0 : i32
    %c0_i32_0 = arith.constant 0 : i32
    %c0_i32_1 = arith.constant 0 : i32
    return %arg0, %c0_i32, %c0_i32_0 : i32, i32, i32
  }
  func.func @transform_1(%arg0: i32) -> (i32, i32) {
    %c0_i32 = arith.constant 0 : i32
    %c0_i32_0 = arith.constant 0 : i32
    %c0_i32_1 = arith.constant 0 : i32
    return %c0_i32, %c0_i32_0 : i32, i32
  }
  func.func @transform_2(%arg0: i32) -> (i32, i32) {
    %c0_i32 = arith.constant 0 : i32
    %c0_i32_0 = arith.constant 0 : i32
    %c0_i32_1 = arith.constant 0 : i32
    return %c0_i32, %c0_i32_0 : i32, i32
  }
  func.func @transform_3(%arg0: i32) -> (i32, i32) {
    %c0_i32 = arith.constant 0 : i32
    %c0_i32_0 = arith.constant 0 : i32
    %c0_i32_1 = arith.constant 0 : i32
    return %c0_i32, %c0_i32_0 : i32, i32
  }
  func.func @transform_4(%arg0: i32) -> (i32, i32) {
    %c0_i32 = arith.constant 0 : i32
    %c0_i32_0 = arith.constant 0 : i32
    %c0_i32_1 = arith.constant 0 : i32
    return %c0_i32, %c0_i32_0 : i32, i32
  }
  func.func @transform_5(%arg0: i32) -> (i32, i32) {
    %c0_i32 = arith.constant 0 : i32
    %c0_i32_0 = arith.constant 0 : i32
    %c0_i32_1 = arith.constant 0 : i32
    return %c0_i32, %c0_i32_0 : i32, i32
  }
  func.func @transform_6(%arg0: i32) -> (i32, i32) {
    %c0_i32 = arith.constant 0 : i32
    %c0_i32_0 = arith.constant 0 : i32
    %c0_i32_1 = arith.constant 0 : i32
    return %c0_i32, %c0_i32_0 : i32, i32
  }
  func.func @transform_7(%arg0: i32) -> (i32, i32) {
    %c0_i32 = arith.constant 0 : i32
    %c0_i32_0 = arith.constant 0 : i32
    return %arg0, %c0_i32 : i32, i32
  }
}

</mosaic_0001>

<bundles_post_ra>
// kernel: _lambda_.1
= control target key start
LH: loop header
LB: loop body
LE: loop exit
PB: predicated region body
PF: predicated region fallthrough
CT: control target
= control target key end

     0   :  { %12 = vsyncpa [#allocation4], 0  ;;  %s2394_s0 = inlined_call_operand.vmem [shape: f32[8,4,256], index: 0, kind: input, shape index: {}]   ;;  %s2395_s1 = inlined_call_operand.vmem [shape: bf16[4,128], index: 1, kind: input, shape index: {}]   ;;  %s2396_s2 = inlined_call_operand.vmem [shape: f32[1,128], index: 2, kind: input, shape index: {}]   ;;  %s2397_s3 = inlined_call_operand.hbm [shape: bf16[128,1024], index: 3, kind: input, shape index: {}]   ;;  %s2398_s4 = inlined_call_operand.vmem [shape: f32[1,1024], index: 4, kind: input, shape index: {}]   ;;  %s2399_s5 = inlined_call_operand.hbm [shape: bf16[1024,128], index: 5, kind: input, shape index: {}]   ;;  %s2400_s6 = inlined_call_operand.vmem [shape: f32[1,128], index: 6, kind: input, shape index: {}]   ;;  %s2401_s7 = inlined_call_operand.vmem [shape: f32[8,128], index: 7, kind: output, shape index: {}]  }
   0x1   :  { %s24_s26 = sshll.u32 %s2397_s3, 4  ;;  %s25_s26 = int_to_ptr.hbm [resolvable:$true] %s24_s26 }
   0x2   :  { %13 = vsyncpa [#allocation6], 0  ;;  %s2222_s27 = smov [#allocation3]   ;;  %s39_s8 = sshll.u32 %s2399_s5, 4  ;;  %s40_s8 = int_to_ptr.hbm [resolvable:$true] %s39_s8 }
   0x3   :  { %s26_s28 = sshll.u32 %s2222_s27, 4  ;;  %s2223_s9 = smov 512   ;;  %s27_s28 = int_to_ptr.vmem [resolvable:$true] %s26_s28 }
   0x4   :  { %s2224_s10 = smov 32   ;;  %s2225_s11 = smov [#allocation5]  }
   0x5   :  { %32 = dma.hbm_to_vmem [thread:$0]  %s25_s26, 8192, %s27_s28, [#allocation4], %s2223_s9, %s2223_s9, %s2224_s10  }
   0x6   :  { %s41_s12 = sshll.u32 %s2225_s11, 4  ;;  %s2226_s13 = smov 64   ;;  %s42_s12 = int_to_ptr.vmem [resolvable:$true] %s41_s12 }
   0x7   :  { %s2227_s14 = smov 4  }
   0x8   :  { %47 = dma.hbm_to_vmem [thread:$0]  %s40_s8, 8192, %s42_s12, [#allocation6], %s2226_s13, %s2226_s13, %s2227_s14  }
   0x9   :  { %2214 = dma.done.wait [#allocation4], 8192  }
   0xa   :  { %2215 = vsyncadd [#allocation4], 4294959104 }
   0xb   :  { %2216 = dma.done.wait [#allocation6], 8192  }
   0xc   :  { %2217 = vsyncadd [#allocation6], 4294959104  ;;  %v2278_v0 = vld [vmem:[%s2395_s1] sm:$0x3]  ;;  %s2285_s17 = smov 0  }
   0xd   :  { %v2283_v1 = vld [vmem:[%s2396_s2] sm:$0x1] }
   0xe LB: > { %vm156_vm0 = vcmask 1041408   ;;  %s2014_s18 = sshll.u32 %s2220_s17, 3  ;;  %vm107_vm1 = vcmask 31744   ;;  %v2309_v25 = vperm.slane %v2283_v1, 0  ;;  %s323_s2 = scalar_lea.vmem [#allocation2], %s2220_s17  ;;  %s2220_s17 = sphi %s2285_s17, %s67_s17  }
   0xf   : > { %v158_v2 = vsel %vm156_vm0, %v2278_v0, 0  ;;  %s70_s20 = scalar_lea.vmem %s2394_s0, %s2014_s18  ;;  %s67_s17 = sadd.s32 1, %s2220_s17  }
  0x10   : > { %167 = vmatpush.bf16.msra.mxu0 %v158_v2  ;;  %2144 = vmatpush.bf16.msra.mxu3 %v158_v2  ;;  %v71_v3 = vld [vmem:[%s70_s20] sm:$0xff]  ;;  %p64_p0 = scmp.ge.s32.totalorder %s67_s17, 8  }
  0x11   : > { %2143 = vmatpush.bf16.msra.mxu1 %v158_v2  ;;  %73 = vst [vmem:[#allocation1] ss:$2 sm:$0xff] %v71_v3  ;;  %v2064_v1 = vld [vmem:[#allocation3 + $0x18c] sm:$0xf] (%p64_p0) }
  0x18   : > { %v74_v4 = vld.sshfl [vmem:[#allocation1] sm:$0xff pattern:$0x75316420]  ;;  %v75_v5 = vld.sshfl [vmem:[#allocation1 + $0x8] sm:$0xff pattern:$0x75316420] }
  0x19   : > { %v78_v6 = vpack.c.bf16 %v74_v4, %v74_v4  ;;  %v79_v7 = vpack.c.bf16 %v75_v5, %v75_v5 }
  0x1b   : > { %83 = vxpose.binary.xlu0.c.b16.start.end [1/2] (short) %v79_v7, %v78_v6, 128 }
  0xc7   : > { %v91_v8 = vpop.trf.xlu0 }
  0xc8   : > { %1486 = vmatmul.msk.bf16.vlgmr.msra.gmra.mxu0 %vm107_vm1, %v91_v8 }
  0xcf   : > { %v92_v9 = vpop.trf.xlu0 }
  0xd7   : > { %v93_v10 = vpop.trf.xlu0 }
  0xd8   : > { %1487 = vmatmul.msk.bf16.gmra.mxu0 %vm107_vm1, %v93_v10 }
  0xdf   : > { %v94_v11 = vpop.trf.xlu0 }
  0xe7   : > { %v95_v12 = vpop.trf.xlu0 }
  0xe8   : > { %1488 = vmatmul.msk.bf16.gmra.mxu0 %vm107_vm1, %v95_v12 }
  0xef   : > { %v96_v13 = vpop.trf.xlu0 }
  0xf7   : > { %v97_v14 = vpop.trf.xlu0 }
  0xf8   : > { %1489 = vmatmul.msk.bf16.gmra.mxu0 %vm107_vm1, %v97_v14 }
  0xff   : > { %v98_v15 = vpop.trf.xlu0 }
 0x100   : > { %1497 = vmatmul.msk.bf16.vlgmr.msra.gmra.mxu3 %vm107_vm1, %v98_v15 }
 0x107   : > { %v99_v16 = vpop.trf.xlu0 }
 0x108   : > { %1490 = vmatmul.msk.bf16.gmra.mxu0 %vm107_vm1, %v99_v16 }
 0x10f   : > { %v100_v17 = vpop.trf.xlu0 }
 0x110   : > { %1498 = vmatmul.msk.bf16.gmra.mxu3 %vm107_vm1, %v100_v17 }
 0x117   : > { %v101_v18 = vpop.trf.xlu0 }
 0x118   : > { %1491 = vmatmul.msk.bf16.gmra.mxu0 %vm107_vm1, %v101_v18 }
 0x11f   : > { %v102_v19 = vpop.trf.xlu0 }
 0x120   : > { %1499 = vmatmul.msk.bf16.gmra.mxu3 %vm107_vm1, %v102_v19 }
 0x127   : > { %v103_v20 = vpop.trf.xlu0 }
 0x128   : > { %1492 = vmatmul.msk.bf16.vlgmr.msra.gmra.mxu1 %vm107_vm1, %v103_v20 }
 0x12f   : > { %v104_v21 = vpop.trf.xlu0 }
 0x130   : > { %1500 = vmatmul.msk.bf16.gmra.mxu3 %vm107_vm1, %v104_v21 }
 0x137   : > { %v105_v22 = vpop.trf.xlu0 }
 0x138   : > { %1493 = vmatmul.msk.bf16.gmra.mxu1 %vm107_vm1, %v105_v22 }
 0x13f   : > { %v106_v23 = vpop.trf.xlu0 }
 0x140   : > { %1501 = vmatmul.msk.bf16.gmra.mxu3 %vm107_vm1, %v106_v23 }
 0x145   : > { %v169_v24 = vpop.f32.mrf.mxu0 }
 0x146   : > { %v170_v26 = vadd.f32 %v169_v24, %v2309_v25 }
 0x148   : > { %1494 = vmatmul.msk.bf16.gmra.mxu1 %vm107_vm1, %v92_v9  ;;  %v249_v29 = vmax.f32 %v170_v26, 0.0 }
 0x14d   : > { %v171_v27 = vpop.f32.mrf.mxu0 }
 0x14e   : > { %v172_v28 = vadd.f32 %v171_v27, %v2309_v25 }
 0x150   : > { %v250_v30 = vmax.f32 %v172_v28, 0.0 }
 0x152   : > { %v2314_v31 = vpack.c.bf16 %v250_v30, %v249_v29 }
 0x155   : > { %v174_v32 = vpop.f32.mrf.mxu0 }
 0x156   : > { %v175_v33 = vadd.f32 %v174_v32, %v2309_v25 }
 0x158   : > { %1495 = vmatmul.msk.bf16.gmra.mxu1 %vm107_vm1, %v94_v11  ;;  %v251_v36 = vmax.f32 %v175_v33, 0.0 }
 0x15d   : > { %v176_v34 = vpop.f32.mrf.mxu0 }
 0x15e   : > { %v177_v35 = vadd.f32 %v176_v34, %v2309_v25 }
 0x160   : > { %v252_v37 = vmax.f32 %v177_v35, 0.0 }
 0x162   : > { %v2319_v38 = vpack.c.bf16 %v252_v37, %v251_v36 }
 0x165   : > { %v179_v39 = vpop.f32.mrf.mxu0 }
 0x168   : > { %1496 = vmatmul.msk.bf16.gmra.mxu1 %vm107_vm1, %v96_v13 }
 0x16d   : > { %v181_v40 = vpop.f32.mrf.mxu0 }
 0x16e   : > { %v182_v32 = vadd.f32 %v181_v40, %v2309_v25 }
 0x175   : > { %v184_v45 = vpop.f32.mrf.mxu0 }
 0x176   : > { %v185_v24 = vadd.f32 %v184_v45, %v2309_v25 }
 0x17d   : > { %v186_v50 = vpop.f32.mrf.mxu0 }
 0x17e   : > { %v187_v21 = vadd.f32 %v186_v50, %v2309_v25 }
 0x180   : > { %v256_v34 = vmax.f32 %v187_v21, 0.0  ;;  %v1736_v21 = vld [vmem:[#allocation3 + $0x1c8] sm:$0xf] (%p64_p0) }
 0x183   : > { %v224_v41 = vpop.f32.mrf.mxu3 }
 0x184   : > { %v225_v42 = vadd.f32 %v224_v41, %v2309_v25  ;;  %v180_v41 = vadd.f32 %v179_v39, %v2309_v25 }
 0x185   : > { %v189_v52 = vpop.f32.mrf.mxu0 }
 0x186   : > { %v271_v46 = vmax.f32 %v225_v42, 0.0  ;;  %v190_v18 = vadd.f32 %v189_v52, %v2309_v25  ;;  %v255_v42 = vmax.f32 %v185_v24, 0.0  ;;  %v253_v52 = vmax.f32 %v180_v41, 0.0  ;;  %v2072_v24 = vld [vmem:[#allocation3 + $0x1cc] sm:$0xf] (%p64_p0) }
 0x187   :  { %v1706_v41 = vld [vmem:[#allocation3 + $0x1a8] sm:$0xf0] (%p64_p0) }
 0x188   : > { %v257_v27 = vmax.f32 %v190_v18, 0.0  ;;  %v284_v40 = vpack.c.bf16 %v256_v34, %v255_v42  ;;  %v2067_v34 = vld [vmem:[#allocation3 + $0x19c] sm:$0xf0] (%p64_p0)  ;;  %v2063_v42 = vld [vmem:[#allocation3 + $0x184] sm:$0xf] (%p64_p0) }
 0x18b   : > { %v226_v43 = vpop.f32.mrf.mxu3 }
 0x18c   : > { %v227_v44 = vadd.f32 %v226_v43, %v2309_v25 }
 0x18d   : > { %v191_v55 = vpop.f32.mrf.mxu0 }
 0x18e   : > { %v272_v47 = vmax.f32 %v227_v44, 0.0  ;;  %v192_v15 = vadd.f32 %v191_v55, %v2309_v25 }
 0x190   : > { %v2324_v48 = vpack.c.bf16 %v272_v47, %v271_v46  ;;  %v258_v22 = vmax.f32 %v192_v15, 0.0  ;;  %v254_v46 = vmax.f32 %v182_v32, 0.0  ;;  %v1696_v32 = vld [vmem:[#allocation3 + $0x180] sm:$0xf] (%p64_p0) }
 0x192   : > { %v285_v37 = vpack.c.bf16 %v258_v22, %v257_v27 }
 0x193   : > { %v2326_v49 = vpop.f32.mrf.mxu3 }
 0x194   : > { %v230_v39 = vadd.f32 %v2326_v49, %v2309_v25 }
 0x195   : > { %v194_v59 = vpop.f32.mrf.mxu0 }
 0x196   : > { %v195_v12 = vadd.f32 %v194_v59, %v2309_v25  ;;  %v283_v59 = vpack.c.bf16 %v254_v46, %v253_v52  ;;  %v2059_v46 = vld [vmem:[#allocation3 + $0x15c] sm:$0xf0] (%p64_p0)  ;;  %v2056_v52 = vld [vmem:[#allocation3 + $0x14c] sm:$0xf] (%p64_p0) }
 0x198   : > { %v259_v19 = vmax.f32 %v195_v12, 0.0 }
 0x19b   : > { %v231_v51 = vpop.f32.mrf.mxu3 }
 0x19d   : > { %v196_v4 = vpop.f32.mrf.mxu0 }
 0x19e   : > { %v197_v8 = vadd.f32 %v196_v4, %v2309_v25 }
 0x1a0   : > { %v260_v16 = vmax.f32 %v197_v8, 0.0 }
 0x1a2   : > { %v286_v23 = vpack.c.bf16 %v260_v16, %v259_v19 }
 0x1a3   : > { %v234_v53 = vpop.f32.mrf.mxu3 }
 0x1a4   : > { %v235_v47 = vadd.f32 %v234_v53, %v2309_v25  ;;  %v273_v53 = vmax.f32 %v230_v39, 0.0 }
 0x1a5   : > { %v199_v54 = vpop.f32.mrf.mxu1 }
 0x1a6   : > { %v200_v5 = vadd.f32 %v199_v54, %v2309_v25  ;;  %v232_v54 = vadd.f32 %v231_v51, %v2309_v25  ;;  %v2228_v51 = vmov 998259584  }
 0x1a8   : > { %v261_v13 = vmax.f32 %v200_v5, 0.0 }
 0x1ab   : > { %v236_v56 = vpop.f32.mrf.mxu3 }
 0x1ac   : > { %v237_v43 = vadd.f32 %v236_v56, %v2309_v25  ;;  %v275_v56 = vmax.f32 %v235_v47, 0.0 }
 0x1ad   : > { %v201_v57 = vpop.f32.mrf.mxu1 }
 0x1ae   : > { %v202_v2 = vadd.f32 %v201_v57, %v2309_v25  ;;  %v276_v55 = vmax.f32 %v237_v43, 0.0  ;;  %v1709_v43 = vor.u32 (%p64_p0), %v2064_v1, %v1706_v41  ;;  %v2019_v1 = vld [vmem:[#allocation3 + $0x1c] sm:$0xf0] (%p64_p0) }
 0x1b0   : > { %v262_v9 = vmax.f32 %v202_v2, 0.0 }
 0x1b2   : > { %v287_v17 = vpack.c.bf16 %v262_v9, %v261_v13 }
 0x1b3   : > { %v239_v58 = vpop.f32.mrf.mxu3 }
 0x1b4   : > { %v240_v35 = vadd.f32 %v239_v58, %v2309_v25 }
 0x1b5   : > { %v204_v60 = vpop.f32.mrf.mxu1 }
 0x1b6   : > { %v205_v62 = vadd.f32 %v204_v60, %v2309_v25  ;;  %v277_v50 = vmax.f32 %v240_v35, 0.0  ;;  %v274_v60 = vmax.f32 %v232_v54, 0.0  ;;  %v1704_v35 = vld [vmem:[#allocation3 + $0x188] sm:$0xf] (%p64_p0) }
 0x1b8   : > { %v263_v6 = vmax.f32 %v205_v62, 0.0  ;;  %v293_v62 = vpack.c.bf16 %v274_v60, %v273_v53  ;;  %v2051_v60 = vld [vmem:[#allocation3 + $0x11c] sm:$0xf0] (%p64_p0) }
 0x1bb   : > { %v241_v61 = vpop.f32.mrf.mxu3 }
 0x1bc   : > { %v242_v28 = vadd.f32 %v241_v61, %v2309_v25  ;;  %v294_v61 = vpack.c.bf16 %v276_v55, %v275_v56  ;;  %v1674_v55 = vld [vmem:[#allocation3 + $0x168] sm:$0xf0] (%p64_p0) }
 0x1bd   : > { %v206_v63 = vpop.f32.mrf.mxu1  ;;  %v1677_v56 = vor.u32 (%p64_p0), %v2056_v52, %v1674_v55  ;;  %v1752_v52 = vld [vmem:[#allocation3 + $0x1d8] sm:$0xf] (%p64_p0)  ;;  %v2074_v55 = vld [vmem:[#allocation3 + $0x1dc] sm:$0xf] (%p64_p0) }
 0x1be   : > { %v207_v3 = vadd.f32 %v206_v63, %v2309_v25  ;;  %v278_v44 = vmax.f32 %v242_v28, 0.0 }
 0x1c0   : > { %v264_v7 = vmax.f32 %v207_v3, 0.0  ;;  %v295_v57 = vpack.c.bf16 %v278_v44, %v277_v50  ;;  %v1698_v44 = vld [vmem:[#allocation3 + $0x1a0] sm:$0xf0] (%p64_p0)  ;;  %v1672_v50 = vld [vmem:[#allocation3 + $0x148] sm:$0xf] (%p64_p0) }
 0x1c1   :  { %v1701_v47 = vor.u32 (%p64_p0), %v2063_v42, %v1698_v44  ;;  %v2020_v44 = vld [vmem:[#allocation3 + $0x24] sm:$0xf0] (%p64_p0) }
 0x1c2   : > { %v288_v10 = vpack.c.bf16 %v264_v7, %v263_v6 }
 0x1c3   : > { %v244_v11 = vpop.f32.mrf.mxu3 }
 0x1c4   : > { %297 = vmatpush.bf16.msrb.mxu1 %v288_v10  ;;  %v245_v20 = vadd.f32 %v244_v11, %v2309_v25 }
 0x1c5   : > { %v2334_v14 = vpop.f32.mrf.mxu1 }
 0x1c6   : > { %v279_v29 = vmax.f32 %v245_v20, 0.0 }
 0x1c8   : > { %298 = vmatpush.bf16.msrb.mxu1 %v287_v17 }
 0x1cb   : > { %v246_v26 = vpop.f32.mrf.mxu3 }
 0x1cc   : > { %v247_v30 = vadd.f32 %v246_v26, %v2309_v25  ;;  %299 = vmatpush.bf16.msrb.mxu1 %v286_v23  ;;  %v2076_v23 = vld [vmem:[#allocation3 + $0x1e4] sm:$0xf0] (%p64_p0)  ;;  %v1738_v26 = vld [vmem:[#allocation3 + $0x1e8] sm:$0xf0] (%p64_p0) }
 0x1cd   : > { %v211_v33 = vpop.f32.mrf.mxu1  ;;  %v1737_v27 = vor.u32 (%p64_p0), %v2076_v23, %v1736_v21  ;;  %v1741_v28 = vor.u32 (%p64_p0), %v2072_v24, %v1738_v26  ;;  %v2031_v21 = vld [vmem:[#allocation3 + $0x84] sm:$0xf] (%p64_p0) }
 0x1ce   : > { %v280_v36 = vmax.f32 %v247_v30, 0.0  ;;  %v212_v8 = vadd.f32 %v211_v33, %v2309_v25  ;;  %v1730_v30 = vld [vmem:[#allocation3 + $0x1e0] sm:$0xf0] (%p64_p0) }
 0x1cf   :  { %768 = vmatpush.bf16.msra.mxu3 (%p64_p0), %v1741_v28  ;;  %v2027_v28 = vld [vmem:[#allocation3 + $0x5c] sm:$0xf0] (%p64_p0) }
 0x1d0   : > { %300 = vmatpush.bf16.msrb.mxu1 %v285_v37  ;;  %v296_v45 = vpack.c.bf16 %v280_v36, %v279_v29  ;;  %v266_v11 = vmax.f32 %v212_v8, 0.0  ;;  %v2071_v29 = vld [vmem:[#allocation3 + $0x1c4] sm:$0xf] (%p64_p0)  ;;  %v2068_v36 = vld [vmem:[#allocation3 + $0x1a4] sm:$0xf0] (%p64_p0)  ;;  %v1697_v37 = vor.u32 (%p64_p0), %v2067_v34, %v1696_v32 }
 0x1d1   :  { %v1733_v33 = vor.u32 (%p64_p0), %v2071_v29, %v1730_v30  ;;  %v1705_v0 = vor.u32 (%p64_p0), %v2068_v36, %v1704_v35  ;;  %v1544_v29 = vld [vmem:[#allocation3 + $0x48] sm:$0xf] (%p64_p0)  ;;  %v1546_v34 = vld [vmem:[#allocation3 + $0x68] sm:$0xf0] (%p64_p0)  ;;  %v2023_v35 = vld [vmem:[#allocation3 + $0x44] sm:$0xf] (%p64_p0) }
 0x1d2   : > { %310 = vmatpush.bf16.msra.mxu2 %v296_v45  ;;  %v1664_v45 = vld [vmem:[#allocation3 + $0x140] sm:$0xf] (%p64_p0)  ;;  %v2028_v32 = vld [vmem:[#allocation3 + $0x64] sm:$0xf0] (%p64_p0)  ;;  %v1538_v36 = vld [vmem:[#allocation3 + $0x60] sm:$0xf0] (%p64_p0) }
 0x1d3   :  { %v1665_v54 = vor.u32 (%p64_p0), %v2059_v46, %v1664_v45  ;;  %769 = vmatpush.bf16.msra.mxu3 (%p64_p0), %v1709_v43  ;;  %v1545_v41 = vor.u32 (%p64_p0), %v2028_v32, %v1544_v29  ;;  %v1512_v43 = vld [vmem:[#allocation3 + $0x8] sm:$0xf] (%p64_p0)  ;;  %v2016_v45 = vld [vmem:[#allocation3 + $0xc] sm:$0xf] (%p64_p0)  ;;  %v1541_v46 = vor.u32 (%p64_p0), %v2023_v35, %v1538_v36  ;;  %v1658_v32 = vld [vmem:[#allocation3 + $0x138] sm:$0xf0] (%p64_p0) }
 0x1d4   : > { %301 = vmatpush.bf16.msrb.mxu1 %v284_v40  ;;  %v2060_v40 = vld [vmem:[#allocation3 + $0x164] sm:$0xf0] (%p64_p0) }
 0x1d5   : > { %v214_v58 = vpop.f32.mrf.mxu1  ;;  %v1673_v39 = vor.u32 (%p64_p0), %v2060_v40, %v1672_v50  ;;  %v1744_v50 = vld [vmem:[#allocation3 + $0x1d0] sm:$0xf] (%p64_p0) }
 0x1d6   : > { %311 = vmatpush.bf16.msra.mxu2 %v295_v57  ;;  %v215_v6 = vadd.f32 %v214_v58, %v2309_v25  ;;  %v2055_v57 = vld [vmem:[#allocation3 + $0x144] sm:$0xf] (%p64_p0)  ;;  %v2077_v40 = vld [vmem:[#allocation3 + $0x1ec] sm:$0xf0] (%p64_p0) }
 0x1d7   :  { %v1666_v58 = vld [vmem:[#allocation3 + $0x160] sm:$0xf0] (%p64_p0)  ;;  %770 = vmatpush.bf16.msra.mxu3 (%p64_p0), %v1677_v56 }
 0x1d8   : > { %302 = vmatpush.bf16.msrb.mxu1 %v283_v59  ;;  %v267_v10 = vmax.f32 %v215_v6, 0.0  ;;  %v1632_v59 = vld [vmem:[#allocation3 + $0x100] sm:$0xf] (%p64_p0)  ;;  %v1669_v53 = vor.u32 (%p64_p0), %v2055_v57, %v1666_v58  ;;  %v1754_v58 = vld [vmem:[#allocation3 + $0x1f8] sm:$0xf0] (%p64_p0) }
 0x1d9   :  { %v1600_v6 = vld [vmem:[#allocation3 + $0xc0] sm:$0xf] (%p64_p0)  ;;  %v1506_v56 = vld [vmem:[#allocation3 + $0x20] sm:$0xf0] (%p64_p0) }
 0x1da   : > { %312 = vmatpush.bf16.msra.mxu2 %v294_v61  ;;  %v1640_v61 = vld [vmem:[#allocation3 + $0x108] sm:$0xf] (%p64_p0) }
 0x1dc   : > { %303 = vmatpush.bf16.msrb.mxu1 %v2319_v38 }
 0x1dd   : > { %v216_v63 = vpop.f32.mrf.mxu1 }
 0x1de   : > { %313 = vmatpush.bf16.msra.mxu2 %v293_v62  ;;  %v217_v4 = vadd.f32 %v216_v63, %v2309_v25  ;;  %v2052_v62 = vld [vmem:[#allocation3 + $0x124] sm:$0xf0] (%p64_p0)  ;;  %v2048_v63 = vld [vmem:[#allocation3 + $0x10c] sm:$0xf] (%p64_p0) }
 0x1e0   : > { %304 = vmatpush.bf16.msrb.mxu1 %v2314_v31  ;;  %v268_v9 = vmax.f32 %v217_v4, 0.0  ;;  %v1641_v4 = vor.u32 (%p64_p0), %v2052_v62, %v1640_v61  ;;  %v2073_v61 = vld [vmem:[#allocation3 + $0x1d4] sm:$0xf] (%p64_p0) }
 0x1e2   : > { %314 = vmatpush.bf16.msra.mxu2 %v2324_v48  ;;  %v210_v48 = vadd.f32 %v2334_v14, %v2309_v25  ;;  %v290_v12 = vpack.c.bf16 %v268_v9, %v267_v10  ;;  %v2075_v14 = vld [vmem:[#allocation3 + $0x1dc] sm:$0xf0] (%p64_p0)  ;;  %v2044_v9 = vld [vmem:[#allocation3 + $0xe4] sm:$0xf0] (%p64_p0)  ;;  %v2039_v10 = vld [vmem:[#allocation3 + $0xc4] sm:$0xf] (%p64_p0) }
 0x1e3   : > { %305 = vmatmul.bf16.vlgmr.msrb.gmra.mxu1 %v2228_v51 }
 0x1e4   : > { %v265_v13 = vmax.f32 %v210_v48, 0.0  ;;  %742 = vmatpush.bf16.msra.mxu1 (%p64_p0), %v1733_v33  ;;  %v1610_v48 = vld [vmem:[#allocation3 + $0xe8] sm:$0xf0] (%p64_p0) }
 0x1e5   : > { %v219_v49 = vpop.f32.mrf.mxu1  ;;  %v2024_v33 = vld [vmem:[#allocation3 + $0x4c] sm:$0xf] (%p64_p0) }
 0x1e6   : > { %v220_v2 = vadd.f32 %v219_v49, %v2309_v25  ;;  %v289_v15 = vpack.c.bf16 %v266_v11, %v265_v13  ;;  %v2047_v49 = vld [vmem:[#allocation3 + $0x104] sm:$0xf] (%p64_p0)  ;;  %v1549_v42 = vor.u32 (%p64_p0), %v2024_v33, %v1546_v34  ;;  %v2049_v33 = vld [vmem:[#allocation3 + $0x114] sm:$0xf] (%p64_p0) }
 0x1e7   :  { %v1602_v11 = vld [vmem:[#allocation3 + $0xe0] sm:$0xf0] (%p64_p0)  ;;  %v1650_v34 = vld [vmem:[#allocation3 + $0x130] sm:$0xf0] (%p64_p0) }
 0x1e8   : > { %v269_v38 = vmax.f32 %v220_v2, 0.0  ;;  %743 = vmatpush.bf16.msra.mxu1 (%p64_p0), %v1701_v47  ;;  %v1634_v2 = vld [vmem:[#allocation3 + $0x120] sm:$0xf0] (%p64_p0)  ;;  %v1514_v47 = vld [vmem:[#allocation3 + $0x28] sm:$0xf0] (%p64_p0) }
 0x1e9   :  { %v1637_v8 = vor.u32 (%p64_p0), %v2047_v49, %v1634_v2  ;;  %v1712_v49 = vld [vmem:[#allocation3 + $0x190] sm:$0xf] (%p64_p0)  ;;  %v1757_v2 = vor.u32 (%p64_p0), %v2074_v55, %v1754_v58  ;;  %v2038_v58 = vld [vmem:[#allocation3 + $0xb4] sm:$0xf0] (%p64_p0) }
 0x1ea   :  { %v2037_v55 = vld [vmem:[#allocation3 + $0xac] sm:$0xf0] (%p64_p0) }
 0x1ec   :  { %744 = vmatpush.bf16.msra.mxu1 (%p64_p0), %v1669_v53  ;;  %v1746_v53 = vld [vmem:[#allocation3 + $0x1f0] sm:$0xf0] (%p64_p0) }
 0x1ed   : > { %v221_v3 = vpop.f32.mrf.mxu1 }
 0x1ee   : > { %v222_v5 = vadd.f32 %v221_v3, %v2309_v25  ;;  %v1728_v25 = vld [vmem:[#allocation3 + $0x1c0] sm:$0xf] (%p64_p0)  ;;  %v1633_v3 = vor.u32 (%p64_p0), %v2051_v60, %v1632_v59  ;;  %v1513_v59 = vor.u32 (%p64_p0), %v2020_v44, %v1512_v43  ;;  %v1517_v60 = vor.u32 (%p64_p0), %v2016_v45, %v1514_v47  ;;  %v2042_v44 = vld [vmem:[#allocation3 + $0xdc] sm:$0xf] (%p64_p0)  ;;  %v1618_v47 = vld [vmem:[#allocation3 + $0xf0] sm:$0xf0] (%p64_p0) }
 0x1ef   :  { %v1729_v22 = vor.u32 (%p64_p0), %v2075_v14, %v1728_v25  ;;  %v2032_v25 = vld [vmem:[#allocation3 + $0x8c] sm:$0xf] (%p64_p0)  ;;  %v1653_v43 = vor.u32 (%p64_p0), %v2049_v33, %v1650_v34  ;;  %v1626_v45 = vld [vmem:[#allocation3 + $0xf8] sm:$0xf0] (%p64_p0) }
 0x1f0   : > { %v270_v7 = vmax.f32 %v222_v5, 0.0  ;;  %745 = vmatpush.bf16.msra.mxu1 (%p64_p0), %v1637_v8  ;;  %v1578_v14 = vld [vmem:[#allocation3 + $0xa8] sm:$0xf0] (%p64_p0)  ;;  %v1722_v8 = vld [vmem:[#allocation3 + $0x1b8] sm:$0xf0] (%p64_p0) }
 0x1f1   :  { %729 = vmatpush.bf16.msra.mxu0 (%p64_p0), %v1729_v22  ;;  %v1570_v22 = vld [vmem:[#allocation3 + $0xa0] sm:$0xf0] (%p64_p0)  ;;  %v1581_v26 = vor.u32 (%p64_p0), %v2032_v25, %v1578_v14  ;;  %v2057_v25 = vld [vmem:[#allocation3 + $0x154] sm:$0xf] (%p64_p0)  ;;  %v2100_v33 = vld [vmem:[#allocation5 + $0xa8] sm:$0xff] (%p64_p0) }
 0x1f2   : > { %v291_v31 = vpack.c.bf16 %v270_v7, %v269_v38  ;;  %v2043_v38 = vld [vmem:[#allocation3 + $0xdc] sm:$0xf0] (%p64_p0)  ;;  %v1608_v7 = vld [vmem:[#allocation3 + $0xc8] sm:$0xf] (%p64_p0)  ;;  %v1573_v30 = vor.u32 (%p64_p0), %v2031_v21, %v1570_v22  ;;  %v1682_v14 = vld [vmem:[#allocation3 + $0x170] sm:$0xf0] (%p64_p0) }
 0x1f3   :  { %v1609_v13 = vor.u32 (%p64_p0), %v2044_v9, %v1608_v7  ;;  %v2066_v7 = vld [vmem:[#allocation3 + $0x19c] sm:$0xf] (%p64_p0)  ;;  %v1685_v29 = vor.u32 (%p64_p0), %v2057_v25, %v1682_v14  ;;  %v2092_v34 = vld [vmem:[#allocation5 + $0x68] sm:$0xff] (%p64_p0) }
 0x1f4   : > { %315 = vmatpush.bf16.msra.mxu2 %v291_v31  ;;  %v2040_v31 = vld [vmem:[#allocation3 + $0xcc] sm:$0xf] (%p64_p0) }
 0x1f5   :  { %730 = vmatpush.bf16.msra.mxu0 (%p64_p0), %v1697_v37 }
 0x1f8   : > { %316 = vmatpush.bf16.msra.mxu2 %v290_v12  ;;  %v1601_v12 = vor.u32 (%p64_p0), %v2043_v38, %v1600_v6  ;;  %v2070_v6 = vld [vmem:[#allocation3 + $0x1b4] sm:$0xf0] (%p64_p0)  ;;  %v1749_v38 = vor.u32 (%p64_p0), %v2073_v61, %v1746_v53  ;;  %v1586_v61 = vld [vmem:[#allocation3 + $0xb0] sm:$0xf0] (%p64_p0) }
 0x1f9   :  { %731 = vmatpush.bf16.msra.mxu0 (%p64_p0), %v1665_v54  ;;  %v2078_v54 = vld [vmem:[#allocation3 + $0x1f4] sm:$0xf0] (%p64_p0) }
 0x1fc   : > { %317 = vmatpush.bf16.msra.mxu2 %v289_v15  ;;  %v1613_v15 = vor.u32 (%p64_p0), %v2040_v31, %v1610_v48  ;;  %v2065_v31 = vld [vmem:[#allocation3 + $0x194] sm:$0xf] (%p64_p0) }
 0x1fd   :  { %732 = vmatpush.bf16.msra.mxu0 (%p64_p0), %v1633_v3  ;;  %v1714_v48 = vld [vmem:[#allocation3 + $0x1b0] sm:$0xf0] (%p64_p0) }
 0x1ff   : > { %318 = vmatmul.bf16.vlgmr.msra.gmra.mxu2 %v2228_v51  ;;  %v1642_v51 = vld [vmem:[#allocation3 + $0x128] sm:$0xf0] (%p64_p0) }
 0x200   :  { %755 = vmatpush.bf16.msra.mxu2 (%p64_p0), %v1737_v27  ;;  %v1645_v5 = vor.u32 (%p64_p0), %v2048_v63, %v1642_v51  ;;  %v1536_v27 = vld [vmem:[#allocation3 + $0x40] sm:$0xf] (%p64_p0)  ;;  %v1745_v63 = vor.u32 (%p64_p0), %v2077_v40, %v1744_v50  ;;  %v1753_v51 = vor.u32 (%p64_p0), %v2078_v54, %v1752_v52  ;;  %v1584_v52 = vld [vmem:[#allocation3 + $0x90] sm:$0xf] (%p64_p0)  ;;  %v1629_v54 = vor.u32 (%p64_p0), %v2042_v44, %v1626_v45  ;;  %v2106_v44 = vld [vmem:[#allocation5 + $0xd8] sm:$0xff] (%p64_p0) }
 0x201   :  { %733 = vmatpush.bf16.msra.mxu0 (%p64_p0), %v1601_v12  ;;  %v1537_v37 = vor.u32 (%p64_p0), %v2027_v28, %v1536_v27  ;;  %v1680_v12 = vld [vmem:[#allocation3 + $0x150] sm:$0xf] (%p64_p0)  ;;  %v1656_v27 = vld [vmem:[#allocation3 + $0x118] sm:$0xf] (%p64_p0)  ;;  %v1585_v53 = vor.u32 (%p64_p0), %v2037_v55, %v1584_v52  ;;  %v2088_v52 = vld [vmem:[#allocation5 + $0x48] sm:$0xff] (%p64_p0) }
 0x202   :  { %771 = vmatpush.bf16.msra.mxu3 (%p64_p0), %v1645_v5  ;;  %v1720_v5 = vld [vmem:[#allocation3 + $0x198] sm:$0xf] (%p64_p0)  ;;  %v2097_v45 = vld [vmem:[#allocation5 + $0x90] sm:$0xff] (%p64_p0) }
 0x203   :  { %v2054_v28 = vld [vmem:[#allocation3 + $0x134] sm:$0xf0] (%p64_p0) }
 0x204   :  { %756 = vmatpush.bf16.msra.mxu2 (%p64_p0), %v1705_v0  ;;  %v1504_v0 = vld [vmem:[#allocation3] sm:$0xf] (%p64_p0)  ;;  %v1657_v36 = vor.u32 (%p64_p0), %v2054_v28, %v1656_v27  ;;  %v2110_v27 = vld [vmem:[#allocation5 + $0xf8] sm:$0xff] (%p64_p0)  ;;  %v2101_v28 = vld [vmem:[#allocation5 + $0xb0] sm:$0xff] (%p64_p0) }
 0x205   :  { %v1505_v57 = vor.u32 (%p64_p0), %v2019_v1, %v1504_v0  ;;  %v2045_v1 = vld [vmem:[#allocation3 + $0xec] sm:$0xf0] (%p64_p0)  ;;  %v2118_v55 = vld [vmem:[#allocation5 + $0x138] sm:$0xff] (%p64_p0) }
 0x206   :  { %772 = vmatpush.bf16.msra.mxu3 (%p64_p0), %v1613_v15  ;;  %v2061_v15 = vld [vmem:[#allocation3 + $0x16c] sm:$0xf0] (%p64_p0) }
 0x207   :  { %v1681_v21 = vor.u32 (%p64_p0), %v2061_v15, %v1680_v12  ;;  %v1528_v12 = vld [vmem:[#allocation3 + $0x18] sm:$0xf] (%p64_p0) }
 0x208   :  { %757 = vmatpush.bf16.msra.mxu2 (%p64_p0), %v1673_v39  ;;  %v2015_v39 = vld [vmem:[#allocation3 + $0x4] sm:$0xf] (%p64_p0) }
 0x209   :  { %v1509_v3 = vor.u32 (%p64_p0), %v2015_v39, %v1506_v56  ;;  %v2034_v56 = vld [vmem:[#allocation3 + $0x9c] sm:$0xf] (%p64_p0) }
 0x20a   :  { %773 = vmatpush.bf16.msra.mxu3 (%p64_p0), %v1581_v26  ;;  %v2053_v26 = vld [vmem:[#allocation3 + $0x12c] sm:$0xf0] (%p64_p0) }
 0x20c   :  { %758 = vmatpush.bf16.msra.mxu2 (%p64_p0), %v1641_v4  ;;  %v2069_v4 = vld [vmem:[#allocation3 + $0x1ac] sm:$0xf0] (%p64_p0) }
 0x20e   :  { %774 = vmatpush.bf16.msra.mxu3 (%p64_p0), %v1549_v42  ;;  %v2046_v42 = vld [vmem:[#allocation3 + $0xf4] sm:$0xf0] (%p64_p0) }
 0x210   :  { %759 = vmatpush.bf16.msra.mxu2 (%p64_p0), %v1609_v13  ;;  %v1725_v13 = vor.u32 (%p64_p0), %v2066_v7, %v1722_v8  ;;  %v1554_v7 = vld [vmem:[#allocation3 + $0x70] sm:$0xf0] (%p64_p0) }
 0x212   :  { %775 = vmatpush.bf16.msra.mxu3 (%p64_p0), %v1517_v60  ;;  %v2033_v60 = vld [vmem:[#allocation3 + $0x94] sm:$0xf] (%p64_p0) }
 0x216   :  { %820 = vmatpush.bf16.msrb.mxu3 (%p64_p0), %v1757_v2  ;;  %v1560_v2 = vld [vmem:[#allocation3 + $0x58] sm:$0xf] (%p64_p0) }
 0x21a   :  { %821 = vmatpush.bf16.msrb.mxu3 (%p64_p0), %v1725_v13  ;;  %v2022_v13 = vld [vmem:[#allocation3 + $0x34] sm:$0xf0] (%p64_p0) }
 0x21b   :  { %v1529_v25 = vor.u32 (%p64_p0), %v2022_v13, %v1528_v12  ;;  %v2138_v12 = vld [vmem:[#allocation5 + $0x1d8] sm:$0xff] (%p64_p0)  ;;  %v2112_v13 = vld [vmem:[#allocation5 + $0x108] sm:$0xff] (%p64_p0) }
 0x260   : > { %v306_v16 = vpop.f32.mrf.mxu1 }
 0x268   : > { %v308_v17 = vpop.f32.mrf.mxu1 }
 0x269   :  { %v2035_v17 = vld [vmem:[#allocation3 + $0x9c] sm:$0xf0] (%p64_p0) }
 0x282   : > { %v319_v18 = vpop.f32.mrf.mxu2 }
 0x283   : > { %v320_v19 = vadd.f32 %v319_v18, %v306_v16  ;;  %v1568_v16 = vld [vmem:[#allocation3 + $0x80] sm:$0xf] (%p64_p0)  ;;  %v1576_v18 = vld [vmem:[#allocation3 + $0x88] sm:$0xf] (%p64_p0) }
 0x284   :  { %v1569_v23 = vor.u32 (%p64_p0), %v2035_v17, %v1568_v16  ;;  %v1688_v16 = vld [vmem:[#allocation3 + $0x158] sm:$0xf] (%p64_p0) }
 0x285   : > { %324 = vst [vmem:[%s323_s2] sm:$0x1] %v320_v19  ;;  %v1605_v19 = vor.u32 (%p64_p0), %v2039_v10, %v1602_v11  ;;  %v1713_v10 = vor.u32 (%p64_p0), %v2069_v4, %v1712_v49  ;;  %v1721_v11 = vor.u32 (%p64_p0), %v2070_v6, %v1720_v5  ;;  %v2062_v17 = vld [vmem:[#allocation3 + $0x174] sm:$0xf0] (%p64_p0)  ;;  %v2029_v49 = vld [vmem:[#allocation3 + $0x6c] sm:$0xf0] (%p64_p0)  ;;  %v1589_v4 = vor.u32 (%p64_p0), %v2033_v60, %v1586_v61  ;;  %v2103_v60 = vld [vmem:[#allocation5 + $0xc0] sm:$0xff] (%p64_p0) }
 0x286   :  { %66 = sbr.rel (!%p64_p0) target bundleno = 14 (0xe), region = 65  ;;  %734 = vmatpush.bf16.msra.mxu0 (%p64_p0), %v1569_v23  ;;  %v1689_v22 = vor.u32 (%p64_p0), %v2062_v17, %v1688_v16  ;;  %v1648_v23 = vld [vmem:[#allocation3 + $0x110] sm:$0xf] (%p64_p0)  ;;  %v2026_v5 = vld [vmem:[#allocation3 + $0x5c] sm:$0xf] (%p64_p0) }
 0x287   :  { %746 = vmatpush.bf16.msra.mxu1 (%p64_p0), %v1605_v19  ;;  %v2058_v19 = vld [vmem:[#allocation3 + $0x15c] sm:$0xf] (%p64_p0)  ;;  %v1649_v35 = vor.u32 (%p64_p0), %v2053_v26, %v1648_v23  ;;  %v2085_v26 = vld [vmem:[#allocation5 + $0x30] sm:$0xff] (%p64_p0) }
 0x288   :  { %v1562_v6 = vld [vmem:[#allocation3 + $0x78] sm:$0xf0] (%p64_p0)  ;;  %v2125_v61 = vld [vmem:[#allocation5 + $0x170] sm:$0xff] (%p64_p0) }
 0x289   :  { %v2018_v16 = vld [vmem:[#allocation3 + $0x1c] sm:$0xf] (%p64_p0) }
 0x28a   : > { %v321_v20 = vpop.f32.mrf.mxu2  ;;  %735 = vmatpush.bf16.msra.mxu0 (%p64_p0), %v1537_v37  ;;  %v1616_v37 = vld [vmem:[#allocation3 + $0xd0] sm:$0xf] (%p64_p0)  ;;  %v1530_v17 = vld [vmem:[#allocation3 + $0x38] sm:$0xf0] (%p64_p0) }
 0x28b   :  { %v2036_v20 = vld [vmem:[#allocation3 + $0xa4] sm:$0xf0]  ;;  %747 = vmatpush.bf16.msra.mxu1 %v1573_v30  ;;  %v2050_v30 = vld [vmem:[#allocation3 + $0x11c] sm:$0xf]  ;;  %v1617_v50 = vor.u32 %v2045_v1, %v1616_v37  ;;  %v1533_v14 = vor.u32 %v2018_v16, %v1530_v17  ;;  %v2099_v37 = vld [vmem:[#allocation5 + $0xa0] sm:$0xff] }
 0x28c   :  { %v1577_v24 = vor.u32 %v2036_v20, %v1576_v18  ;;  %v325_v62 = vld [vmem:[#allocation2] sm:$0xff]  ;;  %v1717_v18 = vor.u32 %v2065_v31, %v1714_v48  ;;  %v1661_v0 = vor.u32 %v2050_v30, %v1658_v32  ;;  %v1520_v48 = vld [vmem:[#allocation3 + $0x10] sm:$0xf]  ;;  %v2084_v30 = vld [vmem:[#allocation5 + $0x28] sm:$0xff] }
 0x28d   :  { %v2365_v9 = vpack.c.bf16 %v325_v62, %v325_v62  ;;  %v1690_v20 = vld [vmem:[#allocation3 + $0x178] sm:$0xf0]  ;;  %v2109_v32 = vld [vmem:[#allocation5 + $0xf0] sm:$0xff]  ;;  %v2120_v17 = vld [vmem:[#allocation5 + $0x148] sm:$0xff] }
 0x28e   :  { %760 = vmatpush.bf16.msra.mxu2 %v1577_v24  ;;  %736 = vmatpush.bf16.msra.mxu0 %v1505_v57  ;;  %v1693_v24 = vor.u32 %v2058_v19, %v1690_v20  ;;  %v1592_v57 = vld [vmem:[#allocation3 + $0x98] sm:$0xf]  ;;  %v1522_v19 = vld [vmem:[#allocation3 + $0x30] sm:$0xf0] }
 0x28f   :  { %748 = vmatpush.bf16.msra.mxu1 %v1541_v46  ;;  %776 = vmatmul.bf16.vlgmr.msra.gmra.mxu3 %v2365_v9  ;;  %v2041_v46 = vld [vmem:[#allocation3 + $0xd4] sm:$0xf]  ;;  %v1593_v62 = vor.u32 %v2038_v58, %v1592_v57  ;;  %v2102_v23 = vld [vmem:[#allocation5 + $0xb8] sm:$0xff]  ;;  %v2104_v57 = vld [vmem:[#allocation5 + $0xc8] sm:$0xff] }
 0x290   :  { %822 = vmatpush.bf16.msrb.mxu3 %v1693_v24  ;;  %v1621_v39 = vor.u32 %v2041_v46, %v1618_v47  ;;  %v2094_v24 = vld [vmem:[#allocation5 + $0x78] sm:$0xff]  ;;  %v2089_v46 = vld [vmem:[#allocation5 + $0x50] sm:$0xff]  ;;  %v2080_v47 = vld [vmem:[#allocation5 + $0x8] sm:$0xff] }
 0x291   :  { %737 = vmatmul.bf16.vlgmr.msra.gmra.mxu0 %v2365_v9  ;;  %v2082_v1 = vld [vmem:[#allocation5 + $0x18] sm:$0xff]  ;;  %v2095_v58 = vld [vmem:[#allocation5 + $0x80] sm:$0xff] }
 0x292   :  { %761 = vmatpush.bf16.msra.mxu2 %v1545_v41  ;;  %781 = vmatpush.bf16.msrb.mxu0 %v1745_v63  ;;  %v1624_v41 = vld [vmem:[#allocation3 + $0xd8] sm:$0xf]  ;;  %v1552_v63 = vld [vmem:[#allocation3 + $0x50] sm:$0xf] }
 0x293   :  { %749 = vmatpush.bf16.msra.mxu1 %v1509_v3  ;;  %v1625_v40 = vor.u32 %v2046_v42, %v1624_v41  ;;  %v2030_v3 = vld [vmem:[#allocation3 + $0x74] sm:$0xf0]  ;;  %v1553_v8 = vor.u32 %v2029_v49, %v1552_v63  ;;  %v2116_v63 = vld [vmem:[#allocation5 + $0x128] sm:$0xff]  ;;  %v2133_v49 = vld [vmem:[#allocation5 + $0x1b0] sm:$0xff] }
 0x294   :  { %823 = vmatpush.bf16.msrb.mxu3 %v1661_v0  ;;  %v1561_v31 = vor.u32 %v2030_v3, %v1560_v2  ;;  %v2091_v0 = vld [vmem:[#allocation5 + $0x60] sm:$0xff]  ;;  %v2098_v41 = vld [vmem:[#allocation5 + $0x98] sm:$0xff]  ;;  %v2141_v2 = vld [vmem:[#allocation5 + $0x1f0] sm:$0xff] }
 0x295   :  { %v2090_v42 = vld [vmem:[#allocation5 + $0x58] sm:$0xff]  ;;  %v2115_v3 = vld [vmem:[#allocation5 + $0x120] sm:$0xff] }
 0x296   :  { %762 = vmatpush.bf16.msra.mxu2 %v1513_v59  ;;  %782 = vmatpush.bf16.msrb.mxu0 %v1713_v10  ;;  %v1594_v59 = vld [vmem:[#allocation3 + $0xb8] sm:$0xf0]  ;;  %v1565_v10 = vor.u32 %v2026_v5, %v1562_v6  ;;  %v2132_v5 = vld [vmem:[#allocation5 + $0x1a8] sm:$0xff] }
 0x297   :  { %794 = vmatpush.bf16.msrb.mxu1 %v1749_v38  ;;  %v2025_v38 = vld [vmem:[#allocation3 + $0x54] sm:$0xf]  ;;  %v2140_v6 = vld [vmem:[#allocation5 + $0x1e8] sm:$0xff] }
 0x298   :  { %750 = vmatmul.bf16.vlgmr.msra.gmra.mxu1 %v2365_v9  ;;  %824 = vmatpush.bf16.msrb.mxu3 %v1629_v54  ;;  %v1557_v15 = vor.u32 %v2025_v38, %v1554_v7  ;;  %v2079_v54 = vld [vmem:[#allocation5] sm:$0xff]  ;;  %v2114_v38 = vld [vmem:[#allocation5 + $0x118] sm:$0xff] }
 0x299   :  { %763 = vmatmul.bf16.vlgmr.msra.gmra.mxu2 %v2365_v9  ;;  %v2122_v7 = vld [vmem:[#allocation5 + $0x158] sm:$0xff] }
 0x29a   :  { %807 = vmatpush.bf16.msrb.mxu2 %v1753_v51  ;;  %783 = vmatpush.bf16.msrb.mxu0 %v1681_v21  ;;  %v1597_v51 = vor.u32 %v2034_v56, %v1594_v59  ;;  %v2086_v21 = vld [vmem:[#allocation5 + $0x38] sm:$0xff]  ;;  %v2117_v59 = vld [vmem:[#allocation5 + $0x130] sm:$0xff] }
 0x29b   :  { %795 = vmatpush.bf16.msrb.mxu1 %v1717_v18  ;;  %v2017_v18 = vld [vmem:[#allocation3 + $0x14] sm:$0xf]  ;;  %v2126_v56 = vld [vmem:[#allocation5 + $0x178] sm:$0xff] }
 0x29c   :  { %825 = vmatpush.bf16.msrb.mxu3 %v1597_v51  ;;  %v2124_v51 = vld [vmem:[#allocation5 + $0x168] sm:$0xff] }
 0x29e   :  { %808 = vmatpush.bf16.msrb.mxu2 %v1721_v11  ;;  %784 = vmatpush.bf16.msrb.mxu0 %v1649_v35  ;;  %v2021_v11 = vld [vmem:[#allocation3 + $0x2c] sm:$0xf0]  ;;  %v2083_v35 = vld [vmem:[#allocation5 + $0x20] sm:$0xff] }
 0x29f   :  { %796 = vmatpush.bf16.msrb.mxu1 %v1685_v29  ;;  %v1521_v20 = vor.u32 %v2021_v11, %v1520_v48  ;;  %v2093_v29 = vld [vmem:[#allocation5 + $0x70] sm:$0xff]  ;;  %v2130_v11 = vld [vmem:[#allocation5 + $0x198] sm:$0xff] }
 0x2a0   :  { %826 = vmatpush.bf16.msrb.mxu3 %v1565_v10  ;;  %v2113_v48 = vld [vmem:[#allocation5 + $0x110] sm:$0xff] }
 0x2a1   :  { %v2121_v10 = vld [vmem:[#allocation5 + $0x150] sm:$0xff] }
 0x2a2   :  { %809 = vmatpush.bf16.msrb.mxu2 %v1689_v22  ;;  %785 = vmatpush.bf16.msrb.mxu0 %v1617_v50  ;;  %v1525_v22 = vor.u32 %v2017_v18, %v1522_v19  ;;  %v2105_v50 = vld [vmem:[#allocation5 + $0xd0] sm:$0xff] }
 0x2a3   :  { %797 = vmatpush.bf16.msrb.mxu1 %v1653_v43  ;;  %v2081_v43 = vld [vmem:[#allocation5 + $0x10] sm:$0xff] }
 0x2a4   :  { %827 = vmatpush.bf16.msrb.mxu3 %v1533_v14  ;;  %v2129_v18 = vld [vmem:[#allocation5 + $0x190] sm:$0xff] }
 0x2a5   :  { %v2137_v19 = vld [vmem:[#allocation5 + $0x1d0] sm:$0xff] }
 0x2a6   :  { %810 = vmatpush.bf16.msrb.mxu2 %v1657_v36  ;;  %786 = vmatpush.bf16.msrb.mxu0 %v1585_v53  ;;  %v2108_v36 = vld [vmem:[#allocation5 + $0xe8] sm:$0xff]  ;;  %v2134_v53 = vld [vmem:[#allocation5 + $0x1b8] sm:$0xff] }
 0x2a7   :  { %798 = vmatpush.bf16.msrb.mxu1 %v1621_v39  ;;  %828 = vmatmul.bf16.vlgmr.msrb.gmra.mxu3 %v2365_v9  ;;  %v2087_v39 = vld [vmem:[#allocation5 + $0x40] sm:$0xff] }
 0x2a8   :  { %1404 = vmatpush.bf16.msra.mxu3 %v2110_v27 }
 0x2aa   :  { %811 = vmatpush.bf16.msrb.mxu2 %v1625_v40  ;;  %787 = vmatpush.bf16.msrb.mxu0 %v1553_v8  ;;  %v2096_v40 = vld [vmem:[#allocation5 + $0x88] sm:$0xff]  ;;  %v2131_v8 = vld [vmem:[#allocation5 + $0x1a0] sm:$0xff] }
 0x2ab   :  { %799 = vmatpush.bf16.msrb.mxu1 %v1589_v4  ;;  %v2123_v4 = vld [vmem:[#allocation5 + $0x160] sm:$0xff] }
 0x2ac   :  { %1405 = vmatpush.bf16.msra.mxu3 %v2109_v32 }
 0x2ae   :  { %812 = vmatpush.bf16.msrb.mxu2 %v1593_v62  ;;  %788 = vmatpush.bf16.msrb.mxu0 %v1521_v20  ;;  %v2142_v62 = vld [vmem:[#allocation5 + $0x1f8] sm:$0xff] }
 0x2af   :  { %800 = vmatpush.bf16.msrb.mxu1 %v1557_v15  ;;  %v2378_v15 = vld [vmem:[%s2398_s4] sm:$0xff] }
 0x2b0   :  { %1406 = vmatpush.bf16.msra.mxu3 %v2108_v36  ;;  %v393_v16 = vperm.slane %v2378_v15, 0  ;;  %v394_v20 = vperm.slane %v2378_v15, 1  ;;  %v2135_v36 = vld [vmem:[#allocation5 + $0x1c0] sm:$0xff] }
 0x2b1   :  { %789 = vmatmul.bf16.vlgmr.msrb.gmra.mxu0 %v2365_v9 }
 0x2b2   :  { %813 = vmatpush.bf16.msrb.mxu2 %v1561_v31  ;;  %1365 = vmatpush.bf16.msra.mxu0 %v2086_v21  ;;  %v2139_v31 = vld [vmem:[#allocation5 + $0x1e0] sm:$0xff] }
 0x2b3   :  { %801 = vmatpush.bf16.msrb.mxu1 %v1525_v22  ;;  %v2119_v22 = vld [vmem:[#allocation5 + $0x140] sm:$0xff] }
 0x2b6   :  { %814 = vmatpush.bf16.msrb.mxu2 %v1529_v25  ;;  %802 = vmatmul.bf16.vlgmr.msrb.gmra.mxu1 %v2365_v9  ;;  %v2111_v25 = vld [vmem:[#allocation5 + $0x100] sm:$0xff] }
 0x2b7   :  { %1378 = vmatpush.bf16.msra.mxu1 %v2094_v24  ;;  %1366 = vmatpush.bf16.msra.mxu0 %v2085_v26  ;;  %v2136_v24 = vld [vmem:[#allocation5 + $0x1c8] sm:$0xff]  ;;  %v395_v26 = vperm.slane %v2378_v15, 2 }
 0x2b9   :  { %815 = vmatmul.bf16.vlgmr.msrb.gmra.mxu2 %v2365_v9  ;;  %v2107_v9 = vld [vmem:[#allocation5 + $0xe0] sm:$0xff] }
 0x2ba   :  { %1391 = vmatpush.bf16.msra.mxu2 %v2102_v23  ;;  %1407 = vmatpush.bf16.msra.mxu3 %v2107_v9  ;;  %v2128_v23 = vld [vmem:[#allocation5 + $0x188] sm:$0xff] }
 0x2bb   :  { %1379 = vmatpush.bf16.msra.mxu1 %v2093_v29  ;;  %1367 = vmatpush.bf16.msra.mxu0 %v2084_v30 }
 0x2be   :  { %1392 = vmatpush.bf16.msra.mxu2 %v2101_v28  ;;  %1408 = vmatpush.bf16.msra.mxu3 %v2106_v44  ;;  %v396_v28 = vperm.slane %v2378_v15, 3 }
 0x2bf   :  { %1380 = vmatpush.bf16.msra.mxu1 %v2092_v34  ;;  %1368 = vmatpush.bf16.msra.mxu0 %v2083_v35  ;;  %v2127_v35 = vld [vmem:[#allocation5 + $0x180] sm:$0xff] }
 0x2c2   :  { %1393 = vmatpush.bf16.msra.mxu2 %v2100_v33  ;;  %1409 = vmatpush.bf16.msra.mxu3 %v2105_v50 }
 0x2c3   :  { %1381 = vmatpush.bf16.msra.mxu1 %v2091_v0  ;;  %1369 = vmatpush.bf16.msra.mxu0 %v2082_v1 }
 0x2c6   :  { %1394 = vmatpush.bf16.msra.mxu2 %v2099_v37  ;;  %1410 = vmatpush.bf16.msra.mxu3 %v2104_v57 }
 0x2c7   :  { %1382 = vmatpush.bf16.msra.mxu1 %v2090_v42  ;;  %1370 = vmatpush.bf16.msra.mxu0 %v2081_v43 }
 0x2ca   :  { %1395 = vmatpush.bf16.msra.mxu2 %v2098_v41  ;;  %1411 = vmatpush.bf16.msra.mxu3 %v2103_v60 }
 0x2cb   :  { %1383 = vmatpush.bf16.msra.mxu1 %v2089_v46  ;;  %1371 = vmatpush.bf16.msra.mxu0 %v2080_v47 }
 0x2ce   :  { %1396 = vmatpush.bf16.msra.mxu2 %v2097_v45  ;;  %1456 = vmatpush.bf16.msrb.mxu3 %v2142_v62 }
 0x2cf   :  { %1384 = vmatpush.bf16.msra.mxu1 %v2088_v52  ;;  %1372 = vmatpush.bf16.msra.mxu0 %v2079_v54  ;;  %v398_v52 = vperm.slane %v2378_v15, 5 }
 0x2d2   :  { %1397 = vmatpush.bf16.msra.mxu2 %v2096_v40  ;;  %1457 = vmatpush.bf16.msrb.mxu3 %v2141_v2  ;;  %v397_v40 = vperm.slane %v2378_v15, 4 }
 0x2d3   :  { %1417 = vmatpush.bf16.msrb.mxu0 %v2118_v55  ;;  %1385 = vmatpush.bf16.msra.mxu1 %v2087_v39 }
 0x2d6   :  { %1398 = vmatpush.bf16.msra.mxu2 %v2095_v58  ;;  %1458 = vmatpush.bf16.msrb.mxu3 %v2140_v6 }
 0x2d7   :  { %1430 = vmatpush.bf16.msrb.mxu1 %v2126_v56  ;;  %1418 = vmatpush.bf16.msrb.mxu0 %v2117_v59  ;;  %v399_v56 = vperm.slane %v2378_v15, 6  ;;  %v400_v59 = vperm.slane %v2378_v15, 7  ;;  %v2161_v15 = vld [vmem:[%s2400_s6] ss:$0 sm:$0xff] }
 0x2da   :  { %1443 = vmatpush.bf16.msrb.mxu2 %v2134_v53  ;;  %1459 = vmatpush.bf16.msrb.mxu3 %v2139_v31 }
 0x2db   :  { %1431 = vmatpush.bf16.msrb.mxu1 %v2125_v61  ;;  %1419 = vmatpush.bf16.msrb.mxu0 %v2116_v63 }
 0x2de   :  { %1444 = vmatpush.bf16.msrb.mxu2 %v2133_v49  ;;  %1460 = vmatpush.bf16.msrb.mxu3 %v2138_v12 }
 0x2df   :  { %1432 = vmatpush.bf16.msrb.mxu1 %v2124_v51  ;;  %1420 = vmatpush.bf16.msrb.mxu0 %v2115_v3 }
 0x2e2   :  { %1445 = vmatpush.bf16.msrb.mxu2 %v2132_v5  ;;  %1461 = vmatpush.bf16.msrb.mxu3 %v2137_v19 }
 0x2e3   :  { %1433 = vmatpush.bf16.msrb.mxu1 %v2123_v4  ;;  %1421 = vmatpush.bf16.msrb.mxu0 %v2114_v38 }
 0x2e6   :  { %1446 = vmatpush.bf16.msrb.mxu2 %v2131_v8  ;;  %1462 = vmatpush.bf16.msrb.mxu3 %v2136_v24 }
 0x2e7   :  { %1434 = vmatpush.bf16.msrb.mxu1 %v2122_v7  ;;  %1422 = vmatpush.bf16.msrb.mxu0 %v2113_v48 }
 0x2ea   :  { %1447 = vmatpush.bf16.msrb.mxu2 %v2130_v11  ;;  %1463 = vmatpush.bf16.msrb.mxu3 %v2135_v36 }
 0x2eb   :  { %1435 = vmatpush.bf16.msrb.mxu1 %v2121_v10  ;;  %1423 = vmatpush.bf16.msrb.mxu0 %v2112_v13 }
 0x2ee   :  { %1448 = vmatpush.bf16.msrb.mxu2 %v2129_v18 }
 0x2ef   :  { %1436 = vmatpush.bf16.msrb.mxu1 %v2120_v17  ;;  %1424 = vmatpush.bf16.msrb.mxu0 %v2111_v25 }
 0x2f2   :  { %1449 = vmatpush.bf16.msrb.mxu2 %v2128_v23 }
 0x2f3   :  { %1437 = vmatpush.bf16.msrb.mxu1 %v2119_v22 }
 0x2f6   :  { %1450 = vmatpush.bf16.msrb.mxu2 %v2127_v35 }
 0x30e   :  { %v738_v14 = vpop.f32.mrf.mxu0 }
 0x30f   :  { %v739_v21 = vadd.f32 %v738_v14, %v393_v16 }
 0x311   :  { %v833_v29 = vmax.f32 %v739_v21, 0.0 }
 0x312   :  { %v777_v0 = vpop.f32.mrf.mxu3 }
 0x313   :  { %v841_v33 = vpack.c.bf16 %v833_v29, %v833_v29  ;;  %v778_v1 = vadd.f32 %v777_v0, %v396_v28 }
 0x315   :  { %v751_v27 = vpop.f32.mrf.mxu1  ;;  %1373 = vmatmul.bf16.vlgmr.msra.gmra.mxu0 %v841_v33  ;;  %v836_v43 = vmax.f32 %v778_v1, 0.0 }
 0x316   :  { %v752_v30 = vadd.f32 %v751_v27, %v394_v20  ;;  %v740_v42 = vpop.f32.mrf.mxu0 }
 0x317   :  { %v844_v46 = vpack.c.bf16 %v836_v43, %v836_v43 }
 0x318   :  { %v834_v34 = vmax.f32 %v752_v30, 0.0 }
 0x319   :  { %1412 = vmatmul.bf16.vlgmr.msra.gmra.mxu3 %v844_v46 }
 0x31a   :  { %v842_v9 = vpack.c.bf16 %v834_v34, %v834_v34  ;;  %v779_v50 = vpop.f32.mrf.mxu3 }
 0x31c   :  { %v764_v32 = vpop.f32.mrf.mxu2  ;;  %1386 = vmatmul.bf16.vlgmr.msra.gmra.mxu1 %v842_v9 }
 0x31d   :  { %v765_v37 = vadd.f32 %v764_v32, %v395_v26  ;;  %v753_v45 = vpop.f32.mrf.mxu1 }
 0x31f   :  { %v835_v41 = vmax.f32 %v765_v37, 0.0 }
 0x321   :  { %v843_v44 = vpack.c.bf16 %v835_v41, %v835_v41 }
 0x323   :  { %1399 = vmatmul.bf16.vlgmr.msra.gmra.mxu2 %v843_v44 }
 0x324   :  { %v766_v47 = vpop.f32.mrf.mxu2 }
 0x32a   :  { %v829_v51 = vpop.f32.mrf.mxu3 }
 0x32b   :  { %v830_v49 = vadd.f32 %v829_v51, %v400_v59 }
 0x32d   :  { %v840_v4 = vmax.f32 %v830_v49, 0.0 }
 0x32e   :  { %v790_v54 = vpop.f32.mrf.mxu0 }
 0x32f   :  { %v791_v55 = vadd.f32 %v790_v54, %v397_v40  ;;  %v848_v38 = vpack.c.bf16 %v840_v4, %v840_v4 }
 0x331   :  { %v837_v58 = vmax.f32 %v791_v55, 0.0  ;;  %1464 = vmatmul.bf16.vlgmr.msrb.gmra.mxu3 %v848_v38 }
 0x332   :  { %v831_v8 = vpop.f32.mrf.mxu3 }
 0x333   :  { %v803_v57 = vpop.f32.mrf.mxu1  ;;  %v845_v60 = vpack.c.bf16 %v837_v58, %v837_v58 }
 0x334   :  { %v804_v39 = vadd.f32 %v803_v57, %v398_v52 }
 0x335   :  { %1425 = vmatmul.bf16.vlgmr.msrb.gmra.mxu0 %v845_v60 }
 0x336   :  { %v838_v61 = vmax.f32 %v804_v39, 0.0  ;;  %v792_v2 = vpop.f32.mrf.mxu0 }
 0x338   :  { %v846_v62 = vpack.c.bf16 %v838_v61, %v838_v61 }
 0x33a   :  { %1438 = vmatmul.bf16.vlgmr.msrb.gmra.mxu1 %v846_v62 }
 0x33b   :  { %v805_v5 = vpop.f32.mrf.mxu1 }
 0x33c   :  { %v816_v53 = vpop.f32.mrf.mxu2 }
 0x33d   :  { %v817_v63 = vadd.f32 %v816_v53, %v399_v56 }
 0x33f   :  { %v839_v3 = vmax.f32 %v817_v63, 0.0 }
 0x341   :  { %v847_v6 = vpack.c.bf16 %v839_v3, %v839_v3 }
 0x343   :  { %1451 = vmatmul.bf16.vlgmr.msrb.gmra.mxu2 %v847_v6 }
 0x344   :  { %v818_v7 = vpop.f32.mrf.mxu2 }
 0x392   :  { %v1374_v31 = vpop.f32.mrf.mxu0 }
 0x393   :  { %v1375_v18 = vadd.f32 %v2161_v15, %v1374_v31 }
 0x399   :  { %v1387_v48 = vpop.f32.mrf.mxu1 }
 0x39a   :  { %v1376_v10 = vpop.f32.mrf.mxu0  ;;  %v1388_v19 = vadd.f32 %v1387_v48, %v1375_v18 }
 0x39c   :  { %v1413_v13 = vpop.f32.mrf.mxu3 }
 0x3a1   :  { %v1389_v11 = vpop.f32.mrf.mxu1 }
 0x3a4   :  { %v1415_v17 = vpop.f32.mrf.mxu3 }
 0x3a6   :  { %v1400_v12 = vpop.f32.mrf.mxu2 }
 0x3a7   :  { %v1401_v25 = vadd.f32 %v1400_v12, %v1388_v19 }
 0x3a9   :  { %v1414_v21 = vadd.f32 %v1413_v13, %v1401_v25 }
 0x3ae   :  { %v1402_v16 = vpop.f32.mrf.mxu2 }
 0x3b2   :  { %v1426_v20 = vpop.f32.mrf.mxu0 }
 0x3b3   :  { %v1427_v22 = vadd.f32 %v1426_v20, %v1414_v21 }
 0x3b4   :  { %v1465_v29 = vpop.f32.mrf.mxu3 }
 0x3b7   :  { %v1439_v14 = vpop.f32.mrf.mxu1 }
 0x3b8   :  { %v1440_v26 = vadd.f32 %v1439_v14, %v1427_v22 }
 0x3ba   :  { %v1428_v23 = vpop.f32.mrf.mxu0 }
 0x3bc   :  { %v1467_v33 = vpop.f32.mrf.mxu3 }
 0x3bf   :  { %v1441_v24 = vpop.f32.mrf.mxu1 }
 0x3c6   :  { %v1452_v27 = vpop.f32.mrf.mxu2 }
 0x3c7   :  { %v1453_v28 = vadd.f32 %v1452_v27, %v1440_v26 }
 0x3c9   :  { %v1466_v30 = vadd.f32 %v1465_v29, %v1453_v28 }
 0x3cb   :  { %1469 = vst [vmem:[%s2401_s7] sm:$0xff] %v1466_v30 }
 0x3ce   :  { %v1454_v32 = vpop.f32.mrf.mxu2 }
 0x3cf   :  { %1474 = vsyncpa [#allocation4], 1 }
 0x3d0   :  { %1475 = vsyncpa [#allocation6], 1 }

</bundles_post_ra>
